<compile_context>
chip_gen: v7x
topology: tpu7x:2x2x1
jax: 0.10.0
libtpu: 0.0.40
codegen_flags: <defaults>
</compile_context>

<pallas_src>
import math
import functools

import jax
import jax.numpy as jnp
from jax.experimental import pallas as pl
from jax.experimental.pallas import tpu as pltpu


def _cdiv(a, b):
    return (a + b - 1) // b


# ---------------------------------------------------------------------------
# The `register_buffer('pe', ...)` table, built deterministically in JAX.
# ---------------------------------------------------------------------------
def build_pe_table(d_model, max_len=5000, dtype=jnp.float32):
    position = jnp.arange(max_len, dtype=jnp.float32)[:, None]          # (L, 1)
    div_term = jnp.exp(jnp.arange(0, d_model, 2, dtype=jnp.float32)
                       * (-math.log(10000.0) / d_model))                # (D/2,)
    angles = position * div_term                                        # (L, D/2)
    pe = jnp.zeros((max_len, d_model), dtype=jnp.float32)
    pe = pe.at[:, 0::2].set(jnp.sin(angles))
    pe = pe.at[:, 1::2].set(jnp.cos(angles))
    return pe.astype(dtype)


# ---------------------------------------------------------------------------
# Kernels (shared by both layouts; pe broadcasts over rows where needed)
# ---------------------------------------------------------------------------
def _pe_add_kernel(x_ref, pe_ref, o_ref, *, scale):
    y = x_ref[...].astype(jnp.float32) * scale + pe_ref[...].astype(jnp.float32)
    o_ref[...] = y.astype(o_ref.dtype)


def _pe_add_dropout_kernel(x_ref, pe_ref, m_ref, o_ref, *, scale):
    y = x_ref[...].astype(jnp.float32) * scale + pe_ref[...].astype(jnp.float32)
    o_ref[...] = (y * m_ref[...].astype(jnp.float32)).astype(o_ref.dtype)


# ---------------------------------------------------------------------------
# Tiling helpers
# ---------------------------------------------------------------------------
def _vmem_limit_bytes():
    cap = None
    try:
        cap = int(pltpu.get_tpu_info().vmem_capacity_bytes)
    except Exception:
        cap = None
    if not cap or cap <= 0:
        cap = 64 * 1024 * 1024        # conservative (v7x per-TC VMEM)
    # leave headroom for compiler scratch; never exceed 100 MiB
    return min(100 * 1024 * 1024, cap * 3 // 4)


def _pick_row_tile(S, B, D, itemsize, target_bytes):
    """Largest multiple-of-8 divisor of S that fits the byte budget and keeps
    the grid >= 2 steps (when possible).  None if no such divisor exists."""
    cands = [t for t in range(8, S + 1, 8) if S % t == 0]
    if not cands:
        return None
    fit = [t for t in cands if t * D * itemsize <= target_bytes] or [min(cands)]
    multi = [t for t in fit if (B * S) // t >= 2]
    return max(multi) if multi else max(fit)


# ---------------------------------------------------------------------------
# Wrapper
# ---------------------------------------------------------------------------
def positional_encoder(x, pe_table, *, dropout_p=0.1, training=False,
                       rng_key=None, target_block_bytes=None):
    """x: (B, S, D).  Returns dropout(x * sqrt(D) + pe[:S])."""
    B, S, D = x.shape
    max_len = pe_table.shape[0]
    assert pe_table.shape[-1] == D and max_len >= S
    scale = float(math.sqrt(D))
    itemsize = x.dtype.itemsize
    N = S * D

    vmem_limit = _vmem_limit_bytes()
    if target_block_bytes is None:
        # room for double-buffered x-in / mask-in / out tiles (+ small pe tile)
        target_block_bytes = max(512 * 1024, min(8 * 1024 * 1024, vmem_limit // 8))

    use_dropout = bool(training) and dropout_p > 0.0
    if use_dropout:
        if rng_key is None:
            rng_key = jax.random.PRNGKey(0)
        keep_p = 1.0 - float(dropout_p)
        # Tiling/chip-invariant mask: drawn on the logical (B, S, D) shape.
        keep = jax.random.bernoulli(rng_key, keep_p, (B, S, D))
        mask = jnp.where(keep, 1.0 / keep_p, 0.0).astype(x.dtype)

    compiler_params = pltpu.CompilerParams(
        dimension_semantics=("parallel",),          # shards grid across TCs on v7x
        vmem_limit_bytes=int(vmem_limit),
    )
    flops_per_elem = 3 if use_dropout else 2
    bytes_accessed = (B * N * itemsize * (3 if use_dropout else 2)
                      + S * D * pe_table.dtype.itemsize)
    cost = pl.CostEstimate(flops=flops_per_elem * B * N, transcendentals=0,
                           bytes_accessed=bytes_accessed)

    row_tile = (_pick_row_tile(S, B, D, itemsize, target_block_bytes)
                if D % 128 == 0 else None)

    if row_tile is not None:
        # ---- Layout A: (B*S, D).  Dense sublanes AND lanes; pe rows picked by
        #      the index_map, no per-call slice/copy of the pe table.
        R = B * S
        x2 = x.reshape(R, D)
        grid = (R // row_tile,)                       # exact: row_tile | S | B*S
        pe_blocks_per_seq = S // row_tile
        x_spec = pl.BlockSpec((row_tile, D), lambda r: (r, 0))
        pe_spec = pl.BlockSpec((row_tile, D),
                               lambda r: (r % pe_blocks_per_seq, 0))
        out_spec = pl.BlockSpec((row_tile, D), lambda r: (r, 0))
        pe_arg = pe_table                              # full table, no copy
        out_shape2 = jax.ShapeDtypeStruct((R, D), x.dtype)
        extra = (mask.reshape(R, D),) if use_dropout else ()
    else:
        # ---- Layout B: (B, S*D) flattened onto the 128-lane axis (lane-dense
        #      even when D < 128).  pe passed as its free (1, max_len*D) view.
        x2 = x.reshape(B, N)
        bytes_per_col = B * itemsize
        tile_n = max(128, (target_block_bytes // bytes_per_col) // 128 * 128)
        if N <= 128:
            tile_n = N                                 # single tiny full block
        else:
            half = _cdiv(_cdiv(N, 2), 128) * 128       # guarantees >= 2 steps
            tile_n = min(tile_n, half)
        grid = (_cdiv(N, tile_n),)                     # trailing tile is masked
        x_spec = pl.BlockSpec((B, tile_n), lambda i: (0, i))
        pe_spec = pl.BlockSpec((1, tile_n), lambda i: (0, i))
        out_spec = pl.BlockSpec((B, tile_n), lambda i: (0, i))
        pe_arg = pe_table.reshape(1, max_len * D)      # contiguous view, no copy
        out_shape2 = jax.ShapeDtypeStruct((B, N), x.dtype)
        extra = (mask.reshape(B, N),) if use_dropout else ()

    if use_dropout:
        kernel = functools.partial(_pe_add_dropout_kernel, scale=scale)
        in_specs = [x_spec, pe_spec, x_spec]           # mask tiled like x
        args = (x2, pe_arg) + extra
    else:
        kernel = functools.partial(_pe_add_kernel, scale=scale)
        in_specs = [x_spec, pe_spec]
        args = (x2, pe_arg)

    out2 = pl.pallas_call(
        kernel,
        out_shape=out_shape2,
        grid_spec=pltpu.PrefetchScalarGridSpec(
            num_scalar_prefetch=0,
            grid=grid,
            in_specs=in_specs,
            out_specs=out_spec,
        ),
        compiler_params=compiler_params,
        cost_estimate=cost,
    )(*args)

    return out2.reshape(B, S, D)


# ---------------------------------------------------------------------------
# Self-test
# ---------------------------------------------------------------------------
if __name__ == "__main__":
    B, S, D = 2, 8, 32            # batch=2, seq=8, d_model=32
    MAX_LEN = 64

    pe_table = build_pe_table(D, max_len=MAX_LEN)
    x = jax.random.normal(jax.random.PRNGKey(0), (B, S, D), dtype=jnp.float32)

    # --- eval mode (dropout identity), lane-dense layout, 2-step grid --------
    out = jax.block_until_ready(positional_encoder(x, pe_table, training=False))
    ref = x * math.sqrt(D) + pe_table[:S][None, :, :]
    assert out.shape == x.shape
    assert jnp.allclose(out, ref, atol=1e-5, rtol=1e-5), "eval-mode mismatch"

    # --- multi-step grid with a partial trailing tile (layout B) -------------
    S2 = 40                                           # N = 1280 -> tiles of 512
    x_big = jax.random.normal(jax.random.PRNGKey(1), (B, S2, D), dtype=jnp.float32)
    out_big = jax.block_until_ready(
        positional_encoder(x_big, pe_table, training=False,
                           target_block_bytes=B * 512 * 4))
    ref_big = x_big * math.sqrt(D) + pe_table[:S2][None, :, :]
    assert jnp.allclose(out_big, ref_big, atol=1e-5, rtol=1e-5), "tiled mismatch"

    # --- d_model multiple of 128 -> (B*S, D) sublane/lane-dense layout A ----
    D3, S3 = 128, 16
    pe3 = build_pe_table(D3, max_len=MAX_LEN)
    x3 = jax.random.normal(jax.random.PRNGKey(2), (B, S3, D3), dtype=jnp.float32)
    out3 = jax.block_until_ready(positional_encoder(x3, pe3, training=False))
    ref3 = x3 * math.sqrt(D3) + pe3[:S3][None, :, :]
    assert jnp.allclose(out3, ref3, atol=1e-5, rtol=1e-5), "row-layout mismatch"

    # --- training mode: fused, tiling-invariant dropout ----------------------
    p = 0.1
    key = jax.random.PRNGKey(1234)
    out_drop = jax.block_until_ready(
        positional_encoder(x, pe_table, dropout_p=p, training=True, rng_key=key))
    keep = jax.random.bernoulli(key, 1.0 - p, (B, S, D))
    expected = jnp.where(keep, ref / (1.0 - p), 0.0)
    assert jnp.allclose(out_drop, expected, atol=1e-4, rtol=1e-4), "dropout mismatch"

    print("KERNEL_OK")
</pallas_src>

<mosaic_0001>
module attributes {stable_mosaic.version = 11 : i64} {
  func.func @_pe_add_kernel(%arg0: i32, %arg1: memref<2x128xf32, #tpu.memory_space<vmem>>, %arg2: memref<1x128xf32, #tpu.memory_space<vmem>>, %arg3: memref<2x128xf32, #tpu.memory_space<vmem>>) attributes {dimension_semantics = [#tpu.dimension_semantics<parallel>], iteration_bounds = array<i64: 2>, scalar_prefetch = 0 : i64, scratch_operands = 0 : i64, tpu.core_type = #tpu.core_type<tc>, window_params = [{transform_indices = @transform_0, window_bounds = array<i64: 2, 128>}, {transform_indices = @transform_1, window_bounds = array<i64: 1, 128>}, {transform_indices = @transform_2, window_bounds = array<i64: 2, 128>}]} {
    %c0 = arith.constant 0 : index
    %c0_0 = arith.constant 0 : index
    %0 = vector.load %arg1[%c0, %c0_0] : memref<2x128xf32, #tpu.memory_space<vmem>>, vector<2x128xf32>
    %cst = arith.constant 5.65685415 : f32
    %1 = vector.broadcast %cst : f32 to vector<2x128xf32>
    %2 = arith.mulf %0, %1 : vector<2x128xf32>
    %c0_1 = arith.constant 0 : index
    %c0_2 = arith.constant 0 : index
    %3 = vector.load %arg2[%c0_1, %c0_2] : memref<1x128xf32, #tpu.memory_space<vmem>>, vector<1x128xf32>
    %4 = vector.broadcast %3 : vector<1x128xf32> to vector<2x128xf32>
    %5 = arith.addf %2, %4 : vector<2x128xf32>
    %c0_3 = arith.constant 0 : index
    %c0_4 = arith.constant 0 : index
    %6 = vector.load %arg3[%c0_3, %c0_4] : memref<2x128xf32, #tpu.memory_space<vmem>>, vector<2x128xf32>
    tpu.vector_store %arg3[%c0_3, %c0_4], %5 {strides = array<i32>} : memref<2x128xf32, #tpu.memory_space<vmem>>, vector<2x128xf32>,
    return
  }
  func.func @transform_0(%arg0: i32) -> (i32, i32) {
    %c0_i32 = arith.constant 0 : i32
    %c0_i32_0 = arith.constant 0 : i32
    return %c0_i32, %arg0 : i32, i32
  }
  func.func @transform_1(%arg0: i32) -> (i32, i32) {
    %c0_i32 = arith.constant 0 : i32
    %c0_i32_0 = arith.constant 0 : i32
    return %c0_i32, %arg0 : i32, i32
  }
  func.func @transform_2(%arg0: i32) -> (i32, i32) {
    %c0_i32 = arith.constant 0 : i32
    %c0_i32_0 = arith.constant 0 : i32
    return %c0_i32, %arg0 : i32, i32
  }
}

</mosaic_0001>

<bundles_post_ra>
// kernel: tpu_custom_call.1
= control target key start
LH: loop header
LB: loop body
LE: loop exit
PB: predicated region body
PF: predicated region fallthrough
CT: control target
= control target key end

     0   :  { %7 = vsyncpa [#allocation3], 0  ;;  %s727_s0 = inlined_call_operand.hbm [shape: f32[2,256], index: 0, kind: input, shape index: {}]   ;;  %s728_s1 = inlined_call_operand.hbm [shape: f32[1,2048], index: 1, kind: input, shape index: {}]   ;;  %s729_s2 = inlined_call_operand.hbm [shape: f32[2,256], index: 2, kind: output, shape index: {}]  }
   0x1   :  { %9 = vsyncpa [#allocation3 + $0x1], 0 }
   0x2   :  { %10 = vsyncpa [#allocation6], 0 }
   0x3   :  { %12 = vsyncpa [#allocation6 + $0x1], 0 }
   0x4   :  { %13 = vsyncpa [#allocation4], 0 }
   0x5   :  { %15 = vsyncpa [#allocation4 + $0x1], 0  ;;  %s523_s9 = smov 0   ;;  %s525_s10 = smov 0  }
   0x6   :  { %s527_s11 = smov 0   ;;  %s529_s12 = smov 0  }
   0x7 LB: > { %s544_s13 = sadd.s32 4294967295, %s503_s12   ;;  %s308_s14 = sadd.s32 4294967294, %s503_s12   ;;  %s503_s12 = sphi %s529_s12, %s748_s12   ;;  %s499_s11 = sphi %s527_s11, %s747_s11   ;;  %s495_s10 = sphi %s525_s10, %s746_s10   ;;  %s491_s9 = sphi %s523_s9, %s745_s9  }
   0x8   : > { %s548_s15 = sadd.s32 1, %s503_s12   ;;  %s28_s16 = sadd.s32 1, %s499_s11 }
   0x9   : > { %s25_s17 = ssub.s32 %s503_s12, %s548_s15  ;;  %p35_p0 = scmp.ne.s32.totalorder %s499_s11, %s495_s10 }
   0xa   : > { %p26_p1 = scmp.eq.s32.totalorder %s25_s17, 0  ;;  %p36_p2 = scmp.eq.s32.totalorder %s503_s12, 0 }
   0xb   : > { %p41_p3 = scmp.ne.s32.totalorder %s495_s10, %s491_s9  ;;  %p42_p4 = scmp.eq.s32.totalorder %s544_s13, 0 }
   0xc   : > { %s560_s18 = scalar_select %p26_p1, %s499_s11, %s28_s16  }
   0xd   : > { %p562_p5 = por %p36_p2, %p35_p0  ;;  %p566_p6 = por %p42_p4, %p41_p3 }
   0xe   : > { %p91_p7 = scmp.eq.s32.totalorder %s544_s13, 1  ;;  %p97_p8 = scmp.eq.s32.totalorder %s308_s14, 1 }
   0xf   : > { %s733_s20 = scalar_select %p566_p6, 1, 0 }
  0x10   : > { %p339_p10 = scmp.lt.s32.totalorder %s503_s12, 2  ;;  %p573_p11 = por %p91_p7, %p35_p0 }
  0x11   : > { %p577_p12 = por %p97_p8, %p41_p3  ;;  %s582_s23 = sand.u32 1, %s499_s11  }
  0x12   : > { %s734_s21 = scalar_select %p573_p11, 1, 0 }
  0x13   : > { %s735_s22 = scalar_select %p577_p12, 1, 0 }
  0x14   : > { %s312_s24 = sshll.u32 %s503_s12, 5  ;;  %s311_s25 = sshll.u32 %s582_s23, 1 }
  0x15   : > { %s589_s28 = scalar_lea.hbm %s727_s0, %s312_s24  ;;  %s121_s29 = scalar_lea.vmem [#allocation2], %s311_s25 }
  0x16   : > { %s128_s30 = sshll.u32 %s121_s29, 4  ;;  %p593_p13 = pnand %p339_p10, %p562_p5  ;;  %s597_s30 = int_to_ptr.vmem [resolvable:$true] %s128_s30 }
  0x17   : > { %s118_s4 = scalar_lea.sflag [#allocation3], %s582_s23  ;;  %s373_s5 = scalar_lea.hbm %s589_s28, 32 }
  0x18   : > { %p374_p2 = scmp.ne.s32.totalorder %s589_s28, %s373_s5  ;;  %p375_p3 = pneg %p593_p13 }
  0x19   : > { %s378_s8 = scalar_lea.hbm %s727_s0, 64  ;;  %p379_p5 = scmp.lt.u32.totalorder %s589_s28, %s727_s0 }
  0x1a   : > { %p376_p4 = pnand %p375_p3, %p374_p2  ;;  %p380_p8 = scmp.lt.u32.totalorder %s378_s8, %s373_s5 }
  0x1b   : > { %p382_p9 = scmp.lt.u32.totalorder %s373_s5, %s589_s28 }
  0x1c   : > { %p377_p7 = pneg %p376_p4  ;;  %p381_p10 = por %p380_p8, %p379_p5 }
  0x1e   : > { %p383_p0 = por %p382_p9, %p381_p10 }
  0x20   : > { %p384_p1 = pnand %p383_p0, %p377_p7 }
  0x22   : > { %387 = shalt.err (!%p384_p1)
}
  0x23   : > { %s388_s17 = scalar_lea.vmem %s597_s30, 32  ;;  %s505_s19 = smov [#allocation2]  }
  0x24   : > { %p389_p2 = scmp.ne.s32.totalorder %s597_s30, %s388_s17  ;;  %s393_s24 = sshll.u32 %s505_s19, 4  ;;  %s394_s24 = int_to_ptr.vmem [resolvable:$false] %s393_s24 }
  0x25   : > { %s395_s25 = scalar_lea.vmem %s394_s24, 64  ;;  %p396_p11 = scmp.lt.s32.totalorder %s597_s30, %s394_s24 }
  0x26   : > { %p391_p4 = pnand %p389_p2, %p375_p3  ;;  %p397_p5 = scmp.lt.s32.totalorder %s395_s25, %s388_s17 }
  0x28   : > { %p392_p12 = pneg %p391_p4  ;;  %p398_p8 = por %p397_p5, %p396_p11 }
  0x2a   : > { %p399_p9 = pnand %p398_p8, %p392_p12 }
  0x2c   : > { %402 = shalt.err (!%p399_p9)
}
  0x2d   : > { %331 = dma.hbm_to_vmem [thread:$0]  (!%p593_p13), %s589_s28, 32, %s597_s30, %s118_s4  }
  0x2e   : > { %p737_p0 = scmp.lt.s32.totalorder %s503_s12, 3  ;;  %p738_p1 = scmp.ge.s32.totalorder %s503_s12, 1 }
  0x2f   : > { %s313_s27 = sshll.u32 %s503_s12, 4  ;;  %s138_s7 = scalar_lea.vmem [#allocation5], %s582_s23 }
  0x30   : > { %p631_p7 = pnand %p738_p1, %p737_p0  ;;  %s639_s6 = scalar_lea.hbm %s728_s1, %s313_s27 }
  0x31   : > { %s145_s8 = sshll.u32 %s138_s7, 4  ;;  %s136_s28 = scalar_lea.sflag [#allocation6], %s582_s23  ;;  %s146_s8 = int_to_ptr.vmem [resolvable:$true] %s145_s8 }
  0x32   : > { %s739_s26 = scalar_select %p631_p7, 1, 0 }
  0x33   : > { %s403_s30 = scalar_lea.hbm %s639_s6, 16  ;;  %s408_s16 = scalar_lea.hbm %s728_s1, 256 }
  0x34   : > { %p404_p11 = scmp.ne.s32.totalorder %s639_s6, %s403_s30  ;;  %p409_p2 = scmp.lt.u32.totalorder %s639_s6, %s728_s1 }
  0x35   : > { %p410_p4 = scmp.lt.u32.totalorder %s408_s16, %s403_s30  ;;  %p412_p8 = scmp.lt.u32.totalorder %s403_s30, %s639_s6 }
  0x36   : > { %p406_p12 = pnand %p404_p11, %p375_p3 }
  0x37   : > { %p411_p5 = por %p410_p4, %p409_p2 }
  0x38   : > { %p407_p10 = pneg %p406_p12 }
  0x39   : > { %p413_p9 = por %p412_p8, %p411_p5 }
  0x3b   : > { %p414_p0 = pnand %p413_p9, %p407_p10 }
  0x3d   : > { %417 = shalt.err (!%p414_p0)
}
  0x3e   : > { %s418_s23 = scalar_lea.vmem %s146_s8, 16  ;;  %s506_s24 = smov [#allocation5]  }
  0x3f   : > { %p419_p1 = scmp.ne.s32.totalorder %s146_s8, %s418_s23  ;;  %s423_s25 = sshll.u32 %s506_s24, 4  ;;  %s424_s25 = int_to_ptr.vmem [resolvable:$false] %s423_s25 }
  0x40   : > { %s425_s27 = scalar_lea.vmem %s424_s25, 32  ;;  %p426_p6 = scmp.lt.s32.totalorder %s146_s8, %s424_s25 }
  0x41   : > { %p421_p11 = pnand %p419_p1, %p375_p3  ;;  %p427_p7 = scmp.lt.s32.totalorder %s425_s27, %s418_s23 }
  0x43   : > { %p422_p12 = pneg %p421_p11  ;;  %p428_p2 = por %p427_p7, %p426_p6 }
  0x45   : > { %p429_p4 = pnand %p428_p2, %p422_p12 }
  0x47   : > { %432 = shalt.err (!%p429_p4)
}
  0x48   : > { %334 = dma.hbm_to_vmem [thread:$0]  (!%p593_p13), %s639_s6, 16, %s146_s8, %s136_s28  }
  0x49   : > { %p740_p10 = scmp.ne.s32.totalorder %s739_s26, 0 }
  0x4a   : > { %s665_s29 = sand.u32 (!%p740_p10), 1, %s495_s10   ;;  %p741_p3 = scmp.ne.s32.totalorder (!%p740_p10), %s733_s20, 0 }
  0x4b   : > { %154 = sbr.rel (%p740_p10) target bundleno = 111 (0x6f), region = 28  ;;  %s315_s5 = sshll.u32 (!%p740_p10), %s665_s29, 1 }
  0x4c   : > { %s157_s7 = scalar_lea.sflag (!%p740_p10), [#allocation3], %s665_s29  ;;  %s160_s30 = scalar_lea.vmem (!%p740_p10), [#allocation2], %s315_s5 }
  0x52   : > { %478 = dma.done.wait (%p741_p3), %s157_s7, 32  }
  0x53   : > { %480 = vsyncadd (%p741_p3), %s157_s7, 4294967264  ;;  %s166_s3 = scalar_lea.sflag [#allocation6], %s665_s29  ;;  %s168_s26 = scalar_lea.vmem [#allocation5], %s665_s29 }
  0x54   : > { %482 = dma.done.wait (%p741_p3), %s166_s3, 16  }
  0x55   : > { %484 = vsyncadd (%p741_p3), %s166_s3, 4294967280  ;;  %v193_v0 = vld [vmem:[%s160_s30] sm:$0x3]  ;;  %s192_s6 = scalar_lea.vmem [#allocation7], %s315_s5  ;;  %s319_s28 = sshll.u32 %s544_s13, 5 }
  0x56   : > { %v317_v1 = vld [vmem:[%s168_s26] ss:$0 sm:$0xff]  ;;  %s218_s8 = sshll.u32 %s192_s6, 4  ;;  %v194_v2 = vmul.f32 5.656854, %v193_v0  ;;  %s685_s20 = scalar_lea.hbm %s729_s2, %s319_s28  ;;  %s680_s8 = int_to_ptr.vmem [resolvable:$true] %s218_s8 }
  0x57   : > { %s205_s16 = scalar_lea.sflag [#allocation4], %s665_s29  ;;  %s433_s17 = scalar_lea.vmem %s680_s8, 32 }
  0x58   : > { %v202_v3 = vadd.f32 %v317_v1, %v194_v2  ;;  %p434_p6 = scmp.ne.s32.totalorder %s680_s8, %s433_s17  ;;  %p742_p13 = scmp.ne.s32.totalorder %s734_s21, 0 }
  0x59   : > { %s507_s13 = smov [#allocation7]  }
  0x5a   : > { %203 = vst [vmem:[%s192_s6] sm:$0x3] %v202_v3  ;;  %p435_p7 = pnand %p434_p6, %p742_p13  ;;  %s437_s19 = sshll.u32 %s507_s13, 4  ;;  %s438_s19 = int_to_ptr.vmem [resolvable:$false] %s437_s19 }
  0x5b   : > { %s439_s23 = scalar_lea.vmem %s438_s19, 64  ;;  %p440_p8 = scmp.lt.s32.totalorder %s680_s8, %s438_s19 }
  0x5c   : > { %p436_p5 = pneg %p435_p7  ;;  %p441_p9 = scmp.lt.s32.totalorder %s439_s23, %s433_s17 }
  0x5e   : > { %p442_p0 = por %p441_p9, %p440_p8 }
  0x60   : > { %p443_p1 = pnand %p442_p0, %p436_p5 }
  0x62   : > { %446 = shalt.err (!%p443_p1)
}
  0x63   : > { %s447_s24 = scalar_lea.hbm %s685_s20, 32  ;;  %s451_s29 = scalar_lea.hbm %s729_s2, 64 }
  0x64   : > { %p448_p11 = scmp.ne.s32.totalorder %s685_s20, %s447_s24  ;;  %p452_p4 = scmp.lt.u32.totalorder %s685_s20, %s729_s2 }
  0x65   : > { %p453_p10 = scmp.lt.u32.totalorder %s451_s29, %s447_s24  ;;  %p455_p6 = scmp.lt.u32.totalorder %s447_s24, %s685_s20 }
  0x66   : > { %p449_p12 = pnand %p448_p11, %p742_p13 }
  0x67   : > { %p454_p3 = por %p453_p10, %p452_p4 }
  0x68   : > { %p450_p2 = pneg %p449_p12 }
  0x69   : > { %p456_p7 = por %p455_p6, %p454_p3 }
  0x6b   : > { %p457_p5 = pnand %p456_p7, %p450_p2 }
  0x6d   : > { %460 = shalt.err (!%p457_p5)
}
  0x6e   : > { %326 = dma.vmem_to_hbm [thread:$0]  (%p742_p13), %s680_s8, 32, %s685_s20, %s205_s16  }
  0x6f PF: > { %s230_s30 = sand.u32 1, %s491_s9   ;;  %p743_p8 = scmp.ne.s32.totalorder %s735_s22, 0 }
  0x70   : > { %p744_p9 = scmp.ge.s32.totalorder %s503_s12, 2  ;;  %s231_s3 = scalar_lea.sflag [#allocation4], %s230_s30 }
  0x72   : > { %p336_p0 = pnand %p744_p9, %p743_p8 }
  0x74   : > { %486 = dma.done.wait (!%p336_p0), %s231_s3, 32  }
  0x75   : > { %488 = vsyncadd (!%p336_p0), %s231_s3, 4294967264  ;;  %p18_p1 = scmp.ge.s32.totalorder %s548_s15, 4   ;;  %s745_s9 = smov %s495_s10 }
  0x76   : > { %s746_s10 = smov %s499_s11  ;;  %s747_s11 = smov %s560_s18 }
  0x77   : > { %s748_s12 = smov %s548_s15  ;;  %20 = sbr.rel (!%p18_p1) target bundleno = 7 (0x7), region = 86 }
  0x7e   :  { %236 = vsyncpa [#allocation3], 1 }
  0x7f   :  { %238 = vsyncpa [#allocation3 + $0x1], 1 }
  0x80   :  { %239 = vsyncpa [#allocation6], 1 }
  0x81   :  { %241 = vsyncpa [#allocation6 + $0x1], 1 }
  0x82   :  { %242 = vsyncpa [#allocation4], 1 }
  0x83   :  { %244 = vsyncpa [#allocation4 + $0x1], 1 }

</bundles_post_ra>
